<compile_context>
chip_gen: v6e
topology: v6e:2x2x1
jax: 0.10.0
libtpu: 0.0.40
codegen_flags: <defaults>
</compile_context>

<pallas_src>
import math

import jax
import jax.numpy as jnp
from jax.experimental import pallas as pl
from jax.experimental.pallas import tpu as pltpu

INPUT_SIZE = 784          # kept un-padded (full-dim block on the lane axis)
HIDDEN_SIZE = 500
NUM_CLASSES = 10

HID_PAD = 512             # 500 -> 4 * 128 (clean matmul-1 N / matmul-2 K)
OUT_PAD = 128             # 10  -> 128     (lane-dense output block)

TILE_B_DEFAULT = 512      # multiple of 16 (bf16 sublane packing); try 1024 on v7x
PARAM_DTYPE = jnp.bfloat16


# ---------------------------------------------------------------------------
# Pallas kernels: one batch tile per grid step; weights resident in VMEM.
# x_ref / w refs arrive in bf16; bias add + ReLU in f32 on the VPU; f32 accum.
# ---------------------------------------------------------------------------
def _linear_kernel(x_ref, w1_ref, b1_ref, o_ref):
    out = jnp.dot(x_ref[...], w1_ref[...], preferred_element_type=jnp.float32)
    o_ref[...] = (out + b1_ref[...]).astype(o_ref.dtype)


def _mlp_kernel(x_ref, w1_ref, b1_ref, w2_ref, b2_ref, o_ref):
    h = jnp.dot(x_ref[...], w1_ref[...], preferred_element_type=jnp.float32)
    h = jnp.maximum(h + b1_ref[...], 0.0)
    out = jnp.dot(h.astype(jnp.bfloat16), w2_ref[...],
                  preferred_element_type=jnp.float32)
    o_ref[...] = (out + b2_ref[...]).astype(o_ref.dtype)


# ---------------------------------------------------------------------------
# Parameter prep (zero-padding of extra columns / rows keeps math identical)
# ---------------------------------------------------------------------------
def _pad2(a, rows, cols):
    return jnp.pad(a, ((0, rows - a.shape[0]), (0, cols - a.shape[1])))


def prepare_params_AB(w1, b1):
    # w1: [784, 10] -> [784, 128] bf16;  b1: [1, 10] -> [1, 128] f32.
    w1p = _pad2(w1, INPUT_SIZE, OUT_PAD).astype(PARAM_DTYPE)
    b1p = _pad2(b1, 1, OUT_PAD).astype(jnp.float32)
    return w1p, b1p


def prepare_params_C(w1, b1, w2, b2):
    w1p = _pad2(w1, INPUT_SIZE, HID_PAD).astype(PARAM_DTYPE)   # [784, 512]
    b1p = _pad2(b1, 1, HID_PAD).astype(jnp.float32)            # [1, 512]
    w2p = _pad2(w2, HID_PAD, OUT_PAD).astype(PARAM_DTYPE)      # [512, 128], 0 rows
    b2p = _pad2(b2, 1, OUT_PAD).astype(jnp.float32)            # [1, 128]
    return w1p, b1p, w2p, b2p


def _pick_tile_b(B):
    # Small batches: a single full-dim block (always layout-legal, any B).
    # Large batches: 512-row tiles (multiple of 16 -> legal for bf16 x).
    if B <= TILE_B_DEFAULT:
        return max(B, 1)
    return TILE_B_DEFAULT


def _prep_x(x):
    # Only op on x outside the kernel is a (fusable) f32->bf16 convert; no pad.
    return x if x.dtype == jnp.bfloat16 else x.astype(jnp.bfloat16)


def _dim_semantics(core_parallel):
    # CORE_PARALLEL guarantees the batch grid splits across v7x's 2 TensorCores.
    return (pltpu.CORE_PARALLEL,) if core_parallel else ("parallel",)


# ---------------------------------------------------------------------------
# Wrappers
# ---------------------------------------------------------------------------
def net_forward_AB(x, w1p, b1p, *, tile_b=None, out_dtype=jnp.float32,
                   core_parallel=False):
    B, IN = x.shape
    tile_b = tile_b or _pick_tile_b(B)
    xb = _prep_x(x)
    grid = (pl.cdiv(B, tile_b),)

    flops = 2 * B * IN * OUT_PAD
    bytes_accessed = (xb.size * xb.dtype.itemsize
                      + w1p.size * w1p.dtype.itemsize
                      + b1p.size * 4
                      + B * OUT_PAD * jnp.dtype(out_dtype).itemsize)

    out = pl.pallas_call(
        _linear_kernel,
        out_shape=jax.ShapeDtypeStruct((B, OUT_PAD), out_dtype),
        grid_spec=pltpu.PrefetchScalarGridSpec(
            num_scalar_prefetch=0,
            grid=grid,
            in_specs=[
                pl.BlockSpec((tile_b, IN), lambda i: (i, 0)),   # streamed x
                pl.BlockSpec((IN, OUT_PAD), lambda i: (0, 0)),  # resident W1
                pl.BlockSpec((1, OUT_PAD), lambda i: (0, 0)),   # resident b1
            ],
            out_specs=pl.BlockSpec((tile_b, OUT_PAD), lambda i: (i, 0)),
        ),
        compiler_params=pltpu.CompilerParams(
            dimension_semantics=_dim_semantics(core_parallel)),
        cost_estimate=pl.CostEstimate(
            flops=flops, transcendentals=0, bytes_accessed=bytes_accessed),
    )(xb, w1p, b1p)
    # TODO(synk): fuse this column slice into the consumer if it matters.
    return out[:, :NUM_CLASSES]


def net_forward_C(x, w1p, b1p, w2p, b2p, *, tile_b=None, out_dtype=jnp.float32,
                  core_parallel=False):
    B, IN = x.shape
    tile_b = tile_b or _pick_tile_b(B)
    xb = _prep_x(x)
    grid = (pl.cdiv(B, tile_b),)

    flops = 2 * B * (IN * HID_PAD + HID_PAD * OUT_PAD)
    bytes_accessed = (xb.size * xb.dtype.itemsize
                      + w1p.size * w1p.dtype.itemsize
                      + w2p.size * w2p.dtype.itemsize
                      + b1p.size * 4 + b2p.size * 4
                      + B * OUT_PAD * jnp.dtype(out_dtype).itemsize)

    out = pl.pallas_call(
        _mlp_kernel,
        out_shape=jax.ShapeDtypeStruct((B, OUT_PAD), out_dtype),
        grid_spec=pltpu.PrefetchScalarGridSpec(
            num_scalar_prefetch=0,
            grid=grid,
            in_specs=[
                pl.BlockSpec((tile_b, IN), lambda i: (i, 0)),    # streamed x
                pl.BlockSpec((IN, HID_PAD), lambda i: (0, 0)),   # resident W1
                pl.BlockSpec((1, HID_PAD), lambda i: (0, 0)),    # resident b1
                pl.BlockSpec((HID_PAD, OUT_PAD), lambda i: (0, 0)),  # resident W2
                pl.BlockSpec((1, OUT_PAD), lambda i: (0, 0)),    # resident b2
            ],
            out_specs=pl.BlockSpec((tile_b, OUT_PAD), lambda i: (i, 0)),
        ),
        compiler_params=pltpu.CompilerParams(
            dimension_semantics=_dim_semantics(core_parallel)),
        cost_estimate=pl.CostEstimate(
            flops=flops, transcendentals=0, bytes_accessed=bytes_accessed),
    )(xb, w1p, b1p, w2p, b2p)
    return out[:, :NUM_CLASSES]


# ---------------------------------------------------------------------------
# Deterministic parameter init (matches nn.Linear's U(-1/sqrt(fan_in), +..))
# ---------------------------------------------------------------------------
def init_linear(key, fan_in, fan_out):
    kw, kb = jax.random.split(key)
    bound = 1.0 / math.sqrt(fan_in)
    # Stored as [IN, OUT] (transposed from PyTorch's [OUT, IN]).
    w = jax.random.uniform(kw, (fan_in, fan_out), jnp.float32, -bound, bound)
    b = jax.random.uniform(kb, (1, fan_out), jnp.float32, -bound, bound)
    return w, b


# ---------------------------------------------------------------------------
# Pure-JAX references mirroring the kernel numerics (bf16 MXU, f32 accumulate)
# ---------------------------------------------------------------------------
def reference_forward_AB(x, w1p, b1p):
    xb = x.astype(jnp.bfloat16)
    out = jnp.dot(xb, w1p, preferred_element_type=jnp.float32) + b1p
    return out[:, :NUM_CLASSES]


def reference_forward_C(x, w1p, b1p, w2p, b2p):
    xb = x.astype(jnp.bfloat16)
    h = jnp.dot(xb, w1p, preferred_element_type=jnp.float32) + b1p
    h = jnp.maximum(h, 0.0)
    out = jnp.dot(h.astype(jnp.bfloat16), w2p,
                  preferred_element_type=jnp.float32) + b2p
    return out[:, :NUM_CLASSES]


if __name__ == "__main__":
    key = jax.random.PRNGKey(0)
    k_x, k_l1, k_l2 = jax.random.split(key, 3)

    batch = 8
    x = jax.random.normal(k_x, (batch, INPUT_SIZE), jnp.float32)

    # Section A/B: single linear 784 -> 10
    w1_ab, b1_ab = init_linear(k_l1, INPUT_SIZE, NUM_CLASSES)
    w1p_ab, b1p_ab = prepare_params_AB(w1_ab, b1_ab)
    out_ab = net_forward_AB(x, w1p_ab, b1p_ab)
    jax.block_until_ready(out_ab)
    ref_ab = reference_forward_AB(x, w1p_ab, b1p_ab)
    assert out_ab.shape == (batch, NUM_CLASSES)
    assert jnp.allclose(out_ab, ref_ab, atol=1e-3, rtol=1e-3), "A/B mismatch"

    # Section C: 784 -> 500 -> relu -> 10
    w1_c, b1_c = init_linear(k_l1, INPUT_SIZE, HIDDEN_SIZE)
    w2_c, b2_c = init_linear(k_l2, HIDDEN_SIZE, NUM_CLASSES)
    w1p_c, b1p_c, w2p_c, b2p_c = prepare_params_C(w1_c, b1_c, w2_c, b2_c)
    out_c = net_forward_C(x, w1p_c, b1p_c, w2p_c, b2p_c)
    jax.block_until_ready(out_c)
    ref_c = reference_forward_C(x, w1p_c, b1p_c, w2p_c, b2p_c)
    assert out_c.shape == (batch, NUM_CLASSES)
    assert jnp.allclose(out_c, ref_c, atol=1e-3, rtol=1e-3), "C mismatch"

    print("KERNEL_OK")
</pallas_src>

<mosaic_0001>
module attributes {stable_mosaic.version = 11 : i64} {
  func.func @_linear_kernel(%arg0: i32, %arg1: memref<8x784xbf16, #tpu.memory_space<vmem>>, %arg2: memref<784x128xbf16, #tpu.memory_space<vmem>>, %arg3: memref<1x128xf32, #tpu.memory_space<vmem>>, %arg4: memref<8x128xf32, #tpu.memory_space<vmem>>) attributes {dimension_semantics = [#tpu.dimension_semantics<parallel>], iteration_bounds = array<i64: 1>, scalar_prefetch = 0 : i64, scratch_operands = 0 : i64, tpu.core_type = #tpu.core_type<tc>, window_params = [{transform_indices = @transform_0, window_bounds = array<i64: 8, 784>}, {pipeline_mode = #tpu.pipeline_mode<synchronous>, transform_indices = @transform_1, window_bounds = array<i64: 784, 128>}, {pipeline_mode = #tpu.pipeline_mode<synchronous>, transform_indices = @transform_2, window_bounds = array<i64: 1, 128>}, {transform_indices = @transform_3, window_bounds = array<i64: 8, 128>}]} {
    %c0 = arith.constant 0 : index
    %c0_0 = arith.constant 0 : index
    %0 = vector.load %arg1[%c0, %c0_0] : memref<8x784xbf16, #tpu.memory_space<vmem>>, vector<8x784xbf16>
    %c0_1 = arith.constant 0 : index
    %c0_2 = arith.constant 0 : index
    %1 = vector.load %arg2[%c0_1, %c0_2] : memref<784x128xbf16, #tpu.memory_space<vmem>>, vector<784x128xbf16>
    %cst = arith.constant dense<0.000000e+00> : vector<8x128xf32>
    %2 = tpu.matmul %0, %1, %cst {dimension_numbers = #tpu.dot_dimension_numbers<[1], [0], [0], [1], [0, 0, 1, 1], [], []>} : vector<8x784xbf16>, vector<784x128xbf16>, vector<8x128xf32> -> vector<8x128xf32>
    %c0_3 = arith.constant 0 : index
    %c0_4 = arith.constant 0 : index
    %3 = vector.load %arg3[%c0_3, %c0_4] : memref<1x128xf32, #tpu.memory_space<vmem>>, vector<1x128xf32>
    %4 = vector.broadcast %3 : vector<1x128xf32> to vector<8x128xf32>
    %5 = arith.addf %2, %4 : vector<8x128xf32>
    %c0_5 = arith.constant 0 : index
    %c0_6 = arith.constant 0 : index
    %6 = vector.load %arg4[%c0_5, %c0_6] : memref<8x128xf32, #tpu.memory_space<vmem>>, vector<8x128xf32>
    tpu.vector_store %arg4[%c0_5, %c0_6], %5 {strides = array<i32>} : memref<8x128xf32, #tpu.memory_space<vmem>>, vector<8x128xf32>,
    return
  }
  func.func @transform_0(%arg0: i32) -> (i32, i32) {
    %c0_i32 = arith.constant 0 : i32
    %c0_i32_0 = arith.constant 0 : i32
    return %arg0, %c0_i32 : i32, i32
  }
  func.func @transform_1(%arg0: i32) -> (i32, i32) {
    %c0_i32 = arith.constant 0 : i32
    %c0_i32_0 = arith.constant 0 : i32
    %c0_i32_1 = arith.constant 0 : i32
    return %c0_i32, %c0_i32_0 : i32, i32
  }
  func.func @transform_2(%arg0: i32) -> (i32, i32) {
    %c0_i32 = arith.constant 0 : i32
    %c0_i32_0 = arith.constant 0 : i32
    %c0_i32_1 = arith.constant 0 : i32
    return %c0_i32, %c0_i32_0 : i32, i32
  }
  func.func @transform_3(%arg0: i32) -> (i32, i32) {
    %c0_i32 = arith.constant 0 : i32
    %c0_i32_0 = arith.constant 0 : i32
    return %arg0, %c0_i32 : i32, i32
  }
}

</mosaic_0001>

<bundles_post_ra>
// kernel: tpu_custom_call.1
= control target key start
LH: loop header
LB: loop body
LE: loop exit
PB: predicated region body
PF: predicated region fallthrough
CT: control target
= control target key end

     0   :  { %8 = vsyncpa [#allocation3], 0  ;;  %s950_s0 = inlined_call_operand.hbm [shape: bf16[8,784], index: 0, kind: input, shape index: {}]   ;;  %s951_s1 = inlined_call_operand.hbm [shape: bf16[784,128], index: 1, kind: input, shape index: {}]   ;;  %s952_s2 = inlined_call_operand.vmem [shape: f32[1,128], index: 2, kind: input, shape index: {}]   ;;  %s953_s3 = inlined_call_operand.hbm [shape: f32[8,128], index: 3, kind: output, shape index: {}]  }
   0x1   :  { %9 = vsyncpa [#allocation6], 0 }
   0x2   :  { %10 = vsyncpa [#allocation4], 0  ;;  %s911_s12 = smov [#allocation2]   ;;  %s912_s14 = smov [#allocation5]  }
   0x3   :  { %s17_s13 = sshll.u32 %s911_s12, 4  ;;  %s26_s15 = sshll.u32 %s912_s14, 4  ;;  %s18_s13 = int_to_ptr.vmem [resolvable:$true] %s17_s13  ;;  %s27_s15 = int_to_ptr.vmem [resolvable:$true] %s26_s15 }
   0x4   :  { %s853_s16 = scalar_lea.vmem %s18_s13, 448  ;;  %p858_p1 = scmp.lt.s32.totalorder %s18_s13, %s18_s13 }
   0x5   :  { %p854_p0 = scmp.ne.s32.totalorder %s18_s13, %s853_s16  ;;  %p859_p2 = scmp.lt.s32.totalorder %s853_s16, %s853_s16 }
   0x7   :  { %p860_p3 = por %p859_p2, %p858_p1 }
   0x9   :  { %p861_p4 = pnand %p860_p3, %p854_p0 }
   0xb   :  { %864 = shalt.err (!%p861_p4)
}
   0xc   :  { %20 = dma.hbm_to_vmem [thread:$0]  %s950_s0, 448, %s18_s13, [#allocation3]  }
   0xd   :  { %s873_s19 = scalar_lea.vmem %s27_s15, 6272  ;;  %p878_p6 = scmp.lt.s32.totalorder %s27_s15, %s27_s15 }
   0xe   :  { %p874_p5 = scmp.ne.s32.totalorder %s27_s15, %s873_s19  ;;  %p879_p7 = scmp.lt.s32.totalorder %s873_s19, %s873_s19 }
  0x10   :  { %p880_p8 = por %p879_p7, %p878_p6 }
  0x12   :  { %p881_p9 = pnand %p880_p8, %p874_p5 }
  0x14   :  { %884 = shalt.err (!%p881_p9)
}
  0x15   :  { %s913_s20 = smov 64   ;;  %s914_s21 = smov 4  }
  0x16   :  { %32 = dma.hbm_to_vmem [thread:$0]  %s951_s1, 6272, %s27_s15, [#allocation6], %s913_s20, %s913_s20, %s914_s21  }
  0x17   :  { %905 = dma.done.wait [#allocation3], 448  }
  0x18   :  { %906 = vsyncadd [#allocation3], 4294966848 }
  0x19   :  { %907 = dma.done.wait [#allocation6], 6272  }
  0x1a   :  { %908 = vsyncadd [#allocation6], 4294961024  ;;  %v789_v0 = vld [vmem:[#allocation5 + $0x78] sm:$0xff]   ;;  %v793_v4 = vld [vmem:[#allocation5 + $0x70] sm:$0xff]   ;;  %v915_v43 = vmov 0.0   ;;  %vm916_vm0 = vmmov 0  }
  0x1b   :  { %v790_v1 = vld [vmem:[#allocation5 + $0x38] sm:$0xff]   ;;  %708 = vmatprep.subr.bf16.mxu0 %v789_v0  ;;  %v794_v5 = vld [vmem:[#allocation5 + $0x30] sm:$0xff]   ;;  %v797_v8 = vld [vmem:[#allocation5 + $0x68] sm:$0xff]   ;;  %vm469_vm1 = vcmask 130048   ;;  %s917_s24 = smov [#allocation7]  }
  0x1c   :  { %v791_v2 = vld [vmem:[#allocation5 + $0xf8] sm:$0xff]   ;;  %709 = vmatpush3.bf16.msra.mxu0 %v790_v1  ;;  %v795_v6 = vld [vmem:[#allocation5 + $0xf0] sm:$0xff]   ;;  %v798_v9 = vld [vmem:[#allocation5 + $0x28] sm:$0xff]   ;;  %s640_s25 = sshll.u32 %s917_s24, 4  ;;  %s641_s25 = int_to_ptr.vmem [resolvable:$true] %s640_s25 }
  0x1d   :  { %v792_v3 = vld [vmem:[#allocation5 + $0xb8] sm:$0xff]   ;;  %730 = vmatprep.subr.bf16.mxu1 %v791_v2  ;;  %710 = vmatprep.subr.bf16.mxu0 %v793_v4  ;;  %v796_v7 = vld [vmem:[#allocation5 + $0xb0] sm:$0xff]   ;;  %v799_v10 = vld [vmem:[#allocation5 + $0xe8] sm:$0xff]   ;;  %s885_s26 = scalar_lea.vmem %s641_s25, 128  ;;  %p890_p11 = scmp.lt.s32.totalorder %s641_s25, %s641_s25 }
  0x1e   :  { %731 = vmatpush3.bf16.msra.mxu1 %v792_v3  ;;  %v800_v11 = vld [vmem:[#allocation5 + $0xa8] sm:$0xff]   ;;  %v801_v12 = vld [vmem:[#allocation5 + $0x60] sm:$0xff]   ;;  %v805_v16 = vld [vmem:[#allocation5 + $0x58] sm:$0xff]   ;;  %p886_p10 = scmp.ne.s32.totalorder %s641_s25, %s885_s26  ;;  %p891_p12 = scmp.lt.s32.totalorder %s885_s26, %s885_s26 }
  0x1f   :  { %732 = vmatprep.subr.bf16.mxu1 %v795_v6  ;;  %v802_v13 = vld [vmem:[#allocation5 + $0x20] sm:$0xff]   ;;  %v806_v17 = vld [vmem:[#allocation5 + $0x18] sm:$0xff]   ;;  %v809_v20 = vld [vmem:[#allocation5 + $0x50] sm:$0xff]  }
  0x20   :  { %711 = vmatpush3.bf16.msra.mxu0 %v794_v5  ;;  %v803_v14 = vld [vmem:[#allocation5 + $0xe0] sm:$0xff]   ;;  %v807_v18 = vld [vmem:[#allocation5 + $0xd8] sm:$0xff]   ;;  %v810_v21 = vld [vmem:[#allocation5 + $0x10] sm:$0xff]   ;;  %p892_p13 = por %p891_p12, %p890_p11 }
  0x21   :  { %712 = vmatprep.subr.bf16.mxu0 %v797_v8  ;;  %v804_v15 = vld [vmem:[#allocation5 + $0xa0] sm:$0xff]   ;;  %v808_v19 = vld [vmem:[#allocation5 + $0x98] sm:$0xff]   ;;  %v811_v22 = vld [vmem:[#allocation5 + $0xd0] sm:$0xff]  }
  0x22   :  { %733 = vmatpush3.bf16.msra.mxu1 %v796_v7  ;;  %v812_v23 = vld [vmem:[#allocation5 + $0x90] sm:$0xff]   ;;  %v813_v24 = vld [vmem:[#allocation5 + $0x48] sm:$0xff]   ;;  %v817_v28 = vld [vmem:[#allocation5 + $0x40] sm:$0xff]   ;;  %p893_p0 = pnand %p892_p13, %p886_p10 }
  0x23   :  { %734 = vmatprep.subr.bf16.mxu1 %v799_v10  ;;  %v814_v25 = vld [vmem:[#allocation5 + $0x8] sm:$0xff]   ;;  %v818_v29 = vld [vmem:[#allocation5] sm:$0xff]   ;;  %v823_v35 = vld [vmem:[#allocation5 + $0x178] sm:$0xff]  }
  0x24   :  { %713 = vmatpush3.bf16.msra.mxu0 %v798_v9  ;;  %v815_v26 = vld [vmem:[#allocation5 + $0xc8] sm:$0xff]   ;;  %v819_v30 = vld [vmem:[#allocation5 + $0xc0] sm:$0xff]   ;;  %v826_v39 = vld [vmem:[#allocation5 + $0x138] sm:$0xff]  }
  0x25   :  { %714 = vmatprep.subr.bf16.mxu0 %v801_v12  ;;  %v816_v27 = vld [vmem:[#allocation5 + $0x88] sm:$0xff]   ;;  %v822_v34 = vld [vmem:[#allocation5 + $0x80] sm:$0xff]   ;;  %v827_v40 = vld [vmem:[#allocation5 + $0x170] sm:$0xff]  }
  0x26   :  { %735 = vmatpush3.bf16.msra.mxu1 %v800_v11  ;;  %v42_v31 = vld [vmem:[#allocation2] sm:$0xff]  ;;  %v43_v36 = vld [vmem:[#allocation2 + $0x8] sm:$0xff]  ;;  %v833_v47 = vld [vmem:[#allocation5 + $0x158] sm:$0xff]  }
  0x27   :  { %736 = vmatprep.subr.bf16.mxu1 %v803_v14  ;;  %v651_v32 = vcombine.low %v42_v31, %v42_v31  ;;  %v652_v33 = vcombine.high %v42_v31, %v42_v31  ;;  %v653_v37 = vcombine.low %v43_v36, %v43_v36  ;;  %v654_v38 = vcombine.high %v43_v36, %v43_v36  ;;  %v828_v41 = vld [vmem:[#allocation5 + $0x130] sm:$0xff]   ;;  %v829_v42 = vld [vmem:[#allocation5 + $0x168] sm:$0xff]   ;;  %v831_v45 = vld [vmem:[#allocation5 + $0x160] sm:$0xff]  }
  0x28   :  { %715 = vmatpush3.bf16.msra.mxu0 %v802_v13  ;;  %v830_v44 = vld [vmem:[#allocation5 + $0x128] sm:$0xff]   ;;  %v832_v46 = vld [vmem:[#allocation5 + $0x120] sm:$0xff]   ;;  %v834_v49 = vld [vmem:[#allocation5 + $0x118] sm:$0xff]  }
  0x29   :  { %716 = vmatprep.subr.bf16.mxu0 %v805_v16  ;;  %505 = vmatprep.mubr.bf16.mxu0 %v652_v33  ;;  %v839_v48 = vld [vmem:[#allocation5 + $0x180] sm:$0xff]   ;;  %v835_v50 = vld [vmem:[#allocation5 + $0x150] sm:$0xff]   ;;  %v842_v51 = vld [vmem:[#allocation2 + $0x18] ss:$0 sps:$4 sm:$0xff]  }
  0x2a   :  { %737 = vmatpush3.bf16.msra.mxu1 %v804_v15  ;;  %545 = vmatprep.mubr.bf16.mxu1 %v654_v38  ;;  %v44_v52 = vld [vmem:[#allocation2 + $0x10] sm:$0xff]  ;;  %v837_v55 = vld [vmem:[#allocation5 + $0x148] sm:$0xff]   ;;  %v840_v57 = vld [vmem:[#allocation5 + $0x140] sm:$0xff]  }
  0x2b   :  { %738 = vmatprep.subr.bf16.mxu1 %v807_v18  ;;  %v656_v53 = vcombine.high %v44_v52, %v44_v52  ;;  %v836_v54 = vld [vmem:[#allocation5 + $0x110] sm:$0xff]   ;;  %v838_v56 = vld [vmem:[#allocation5 + $0x108] sm:$0xff]   ;;  %v841_v58 = vld [vmem:[#allocation5 + $0x100] sm:$0xff]   ;;  %v655_v59 = vcombine.low %v44_v52, %v44_v52 }
  0x2c   :  { %717 = vmatpush3.bf16.msra.mxu0 %v806_v17  ;;  %v650_v9 = vld [vmem:[%s952_s2] ss:$0 sm:$0xff] }
  0x2d   :  { %718 = vmatprep.subr.bf16.mxu0 %v809_v20 }
  0x2e   :  { %739 = vmatpush3.bf16.msra.mxu1 %v808_v19 }
  0x2f   :  { %740 = vmatprep.subr.bf16.mxu1 %v811_v22 }
  0x30   :  { %719 = vmatpush3.bf16.msra.mxu0 %v810_v21 }
  0x31   :  { %720 = vmatprep.subr.bf16.mxu0 %v813_v24 }
  0x32   :  { %741 = vmatpush3.bf16.msra.mxu1 %v812_v23 }
  0x33   :  { %742 = vmatprep.subr.bf16.mxu1 %v815_v26 }
  0x34   :  { %721 = vmatpush3.bf16.msra.mxu0 %v814_v25 }
  0x35   :  { %722 = vmatprep.subr.bf16.mxu0 %v817_v28 }
  0x36   :  { %743 = vmatpush3.bf16.msra.mxu1 %v816_v27 }
  0x37   :  { %744 = vmatprep.subr.bf16.mxu1 %v819_v30 }
  0x38   :  { %723 = vmatpush3.bf16.msra.mxu0 %v818_v29 }
  0x39   :  { %752 = vmatprep.subr.bf16.mxu0 %v823_v35 }
  0x3a   :  { %745 = vmatpush3.bf16.msra.mxu1 %v822_v34 }
  0x3b   :  { %506 = vmatmul.mubr.bf16.vlgmr.msra.gmra.mxu0 %v651_v32  ;;  %776 = vmatprep.subr.bf16.mxu1 %v915_v43 }
  0x3c   :  { %753 = vmatpush3.bf16.msra.mxu0 %v826_v39  ;;  %585 = vmatprep.mubr.bf16.mxu0 %v656_v53 }
  0x3d   :  { %546 = vmatmul.mubr.bf16.vlgmr.msra.gmra.mxu1 %v653_v37  ;;  %754 = vmatprep.subr.bf16.mxu0 %v827_v40 }
  0x3e   :  { %778 = vmatprep.mubr.msk.bf16.mxu1 %vm916_vm0, %v915_v43  ;;  %777 = vmatpush3.bf16.msra.mxu1 %v839_v48 }
  0x40   :  { %755 = vmatpush3.bf16.msra.mxu0 %v828_v41 }
  0x41   :  { %756 = vmatprep.subr.bf16.mxu0 %v829_v42 }
  0x44   :  { %757 = vmatpush3.bf16.msra.mxu0 %v830_v44 }
  0x45   :  { %758 = vmatprep.subr.bf16.mxu0 %v831_v45  ;;  %779 = vmatmul.mubr.msk.bf16.vlgmr.msra.gmra.mxu1 %vm469_vm1, %v842_v51 }
  0x48   :  { %759 = vmatpush3.bf16.msra.mxu0 %v832_v46 }
  0x49   :  { %760 = vmatprep.subr.bf16.mxu0 %v833_v47 }
  0x4c   :  { %761 = vmatpush3.bf16.msra.mxu0 %v834_v49 }
  0x4d   :  { %762 = vmatprep.subr.bf16.mxu0 %v835_v50 }
  0x50   :  { %763 = vmatpush3.bf16.msra.mxu0 %v836_v54 }
  0x51   :  { %764 = vmatprep.subr.bf16.mxu0 %v837_v55 }
  0x54   :  { %765 = vmatpush3.bf16.msra.mxu0 %v838_v56 }
  0x55   :  { %766 = vmatprep.subr.bf16.mxu0 %v840_v57 }
  0x58   :  { %767 = vmatpush3.bf16.msra.mxu0 %v841_v58 }
  0x5b   :  { %586 = vmatmul.mubr.bf16.vlgmr.msra.gmra.mxu0 %v655_v59 }
  0xfb   :  { %v724_v60 = vpop.f32.mrf.mxu0 }
  0xfd   :  { %v725_v61 = vpop.f32.mrf.mxu0  ;;  %v746_v62 = vpop.f32.mrf.mxu1 }
  0xfe   :  { %v726_v8 = vadd.f32 %v725_v61, %v724_v60 }
  0xff   :  { %v727_v63 = vpop.f32.mrf.mxu0  ;;  %v747_v0 = vpop.f32.mrf.mxu1 }
 0x100   :  { %v508_v10 = vadd.f32 %v726_v8, %v650_v9  ;;  %v748_v11 = vadd.f32 %v747_v0, %v746_v62 }
 0x101   :  { %v728_v1 = vpop.f32.mrf.mxu0  ;;  %v749_v2 = vpop.f32.mrf.mxu1 }
 0x102   :  { %v548_v14 = vadd.f32 %v748_v11, %v508_v10 }
 0x103   :  { %v750_v3 = vpop.f32.mrf.mxu1 }
 0x105   :  { %v627_v4 = vpop.f32.mrf.mxu1 }
 0x107   :  { %v780_v5 = vpop.f32.mrf.mxu1 }
 0x109   :  { %v630_v6 = vpop.f32.mrf.mxu1 }
 0x10b   :  { %v781_v7 = vpop.f32.mrf.mxu1 }
 0x11b   :  { %v768_v12 = vpop.f32.mrf.mxu0 }
 0x11d   :  { %v769_v13 = vpop.f32.mrf.mxu0 }
 0x11e   :  { %v770_v15 = vadd.f32 %v769_v13, %v768_v12 }
 0x11f   :  { %v771_v16 = vpop.f32.mrf.mxu0 }
 0x120   :  { %v588_v17 = vadd.f32 %v770_v15, %v548_v14 }
 0x121   :  { %v772_v18 = vpop.f32.mrf.mxu0 }
 0x122   :  { %v628_v19 = vadd.f32 %v627_v4, %v588_v17 }
 0x124   :  { %633 = vst [vmem:[#allocation7] sm:$0xff] %v628_v19 }
 0x125   :  { %896 = shalt.err (!%p893_p0)
}
 0x126   :  { %643 = dma.vmem_to_hbm [thread:$0]  %s641_s25, 128, %s953_s3, [#allocation4]  }
 0x127   :  { %909 = dma.done.wait [#allocation4], 128  }
 0x128   :  { %910 = vsyncadd [#allocation4], 4294967168 }
 0x129   :  { %647 = vsyncpa [#allocation3], 1 }
 0x12a   :  { %648 = vsyncpa [#allocation6], 1 }
 0x12b   :  { %649 = vsyncpa [#allocation4], 1 }

</bundles_post_ra>
